<compile_context>
chip_gen: v7x
topology: tpu7x:2x2x1
jax: 0.10.0
libtpu: 0.0.40
codegen_flags: <defaults>
</compile_context>

<pallas_src>
import math

import jax
import jax.numpy as jnp
from jax.experimental import pallas as pl
from jax.experimental.pallas import tpu as pltpu

N_IN = 3        # input features (nn.Flatten of (B, 3) is identity)
HIDDEN = 256    # hidden width
N_OUT = 3       # logits
OUT_MXU = 128   # w4 padded width -> full-lane MXU matmul for layer 4
OUT_STORE = 8   # lanes actually written to HBM (N_OUT rounded up to 8)


def mlp_kernel(x_ref, small_ref, w2_ref, w3_ref, w4_ref, o_ref):
    """Fused MLP on one (TM, *) batch tile.

    small_ref rows: 0..2 = W1 (3x256), 3..5 = b1..b3, 6 = b4 zero-padded, 7 = 0.
    w4_ref is zero-padded to (256, 128); only the first OUT_STORE lanes of the
    layer-4 result are written back (masked vst, tiny HBM DMA).
    """
    x = x_ref[...]              # (TM, 3) f32
    small = small_ref[...]      # (8, 256) f32
    cd = w2_ref.dtype           # compute dtype for the 256-wide MXU layers

    # Layer 1 (K=3): three broadcast multiply-adds on the VPU, skip the MXU.
    h = (x[:, 0:1] * small[0:1, :]
         + x[:, 1:2] * small[1:2, :]
         + x[:, 2:3] * small[2:3, :]
         + small[3:4, :])
    h = jnp.maximum(h, 0.0).astype(cd)

    # Layers 2 & 3: 256x256 MXU matmuls, f32 accumulation, f32 bias + ReLU.
    h = jnp.dot(h, w2_ref[...], preferred_element_type=jnp.float32)
    h = jnp.maximum(h + small[4:5, :], 0.0).astype(cd)
    h = jnp.dot(h, w3_ref[...], preferred_element_type=jnp.float32)
    h = jnp.maximum(h + small[5:6, :], 0.0).astype(cd)

    # Layer 4: full-lane (256, 128) MXU matmul; store only the first 8 lanes.
    h = jnp.dot(h, w4_ref[...], preferred_element_type=jnp.float32)
    o_ref[...] = (h[:, :OUT_STORE] + small[6:7, :OUT_STORE]).astype(o_ref.dtype)


def _round_up(n, m):
    return -(-n // m) * m


def _choose_tiling(B, tm):
    """Pick (B_pad, TM). Guarantees >=2 grid steps when B_pad > 16 so the
    parallel batch axis can shard across both TensorCores on v7x."""
    B_pad = _round_up(max(B, 8), 8)
    if B_pad <= 16:
        return B_pad, B_pad
    TM = min(tm, _round_up(B_pad // 2, 8))
    B_pad = _round_up(B_pad, TM)
    return B_pad, TM


def neural_network_forward(x, packed, *, tm=2048):
    """x: (B, 3) float32 (already flattened). packed: output of pack_params()."""
    B = x.shape[0]
    B_pad, TM = _choose_tiling(B, tm)
    if B_pad != B:
        x = jnp.pad(x, ((0, B_pad - B), (0, 0)))

    small, w2, w3, w4 = packed["small"], packed["w2"], packed["w3"], packed["w4"]
    param_bytes = sum(int(a.size) * a.dtype.itemsize for a in (small, w2, w3, w4))
    cost = pl.CostEstimate(
        flops=2 * B_pad * (N_IN * HIDDEN + 2 * HIDDEN * HIDDEN + HIDDEN * OUT_MXU),
        transcendentals=0,
        bytes_accessed=B_pad * N_IN * 4 + B_pad * OUT_STORE * 4 + param_bytes,
    )

    grid = (B_pad // TM,)
    out = pl.pallas_call(
        mlp_kernel,
        out_shape=jax.ShapeDtypeStruct((B_pad, OUT_STORE), jnp.float32),
        grid_spec=pltpu.PrefetchScalarGridSpec(
            num_scalar_prefetch=0,
            grid=grid,
            in_specs=[
                # x tile marches over the batch axis (tiny ~24 KiB/tile DMA).
                pl.BlockSpec((TM, N_IN), lambda i: (i, 0)),
                # Weights/biases: constant block index -> VMEM-resident across
                # grid steps (fetched once).
                pl.BlockSpec((8, HIDDEN), lambda i: (0, 0)),
                pl.BlockSpec((HIDDEN, HIDDEN), lambda i: (0, 0)),
                pl.BlockSpec((HIDDEN, HIDDEN), lambda i: (0, 0)),
                pl.BlockSpec((HIDDEN, OUT_MXU), lambda i: (0, 0)),
            ],
            out_specs=pl.BlockSpec((TM, OUT_STORE), lambda i: (i, 0)),
        ),
        compiler_params=pltpu.CompilerParams(
            dimension_semantics=("parallel",)),
        cost_estimate=cost,
    )(x, small, w2, w3, w4)
    return out[:B, :N_OUT]


# Jitted end-to-end wrapper (pad -> kernel -> slice fuse/schedule together).
neural_network_forward_jit = jax.jit(neural_network_forward,
                                     static_argnames=("tm",))


def init_params(key):
    """PyTorch nn.Linear-style init: uniform(+/- 1/sqrt(fan_in)); W stored (in, out)."""
    dims = [(N_IN, HIDDEN), (HIDDEN, HIDDEN), (HIDDEN, HIDDEN), (HIDDEN, N_OUT)]
    params = {}
    keys = jax.random.split(key, 2 * len(dims))
    for i, (fan_in, fan_out) in enumerate(dims):
        bound = 1.0 / math.sqrt(fan_in)
        params[f"w{i + 1}"] = jax.random.uniform(
            keys[2 * i], (fan_in, fan_out), minval=-bound, maxval=bound,
            dtype=jnp.float32)
        params[f"b{i + 1}"] = jax.random.uniform(
            keys[2 * i + 1], (fan_out,), minval=-bound, maxval=bound,
            dtype=jnp.float32)
    return params


def pack_params(params, *, use_bf16=False):
    """Pack logical params into the kernel's lane-friendly layout.

    use_bf16=True is recommended on all TPU generations (v5e/v6e/v7x MXUs are
    bf16-native); accumulation and bias/ReLU stay f32 in the kernel.
    """
    small = jnp.zeros((8, HIDDEN), jnp.float32)
    small = small.at[0:3, :].set(params["w1"])
    small = small.at[3, :].set(params["b1"])
    small = small.at[4, :].set(params["b2"])
    small = small.at[5, :].set(params["b3"])
    small = small.at[6, :N_OUT].set(params["b4"])
    w4_pad = jnp.zeros((HIDDEN, OUT_MXU), jnp.float32)
    w4_pad = w4_pad.at[:, :N_OUT].set(params["w4"])
    cd = jnp.bfloat16 if use_bf16 else jnp.float32
    return {
        "small": small,                      # stays f32 (bias math in f32)
        "w2": params["w2"].astype(cd),
        "w3": params["w3"].astype(cd),
        "w4": w4_pad.astype(cd),
    }


def reference_forward(x, params):
    h = x
    for i in (1, 2, 3):
        h = jnp.maximum(h @ params[f"w{i}"] + params[f"b{i}"], 0.0)
    return h @ params["w4"] + params["b4"]


if __name__ == "__main__":
    key = jax.random.PRNGKey(0)
    pkey, xkey, xkey2 = jax.random.split(key, 3)
    params = init_params(pkey)

    # Small batch: 8 samples, 3 features (nn.Flatten of (8, 3) is identity).
    x = jax.random.normal(xkey, (8, N_IN), dtype=jnp.float32)

    # f32 path.
    packed_f32 = pack_params(params, use_bf16=False)
    logits = neural_network_forward_jit(x, packed_f32, tm=2048)
    jax.block_until_ready(logits)
    ref = reference_forward(x, params)
    assert logits.shape == (8, N_OUT)
    assert jnp.allclose(logits, ref, atol=1e-5, rtol=1e-5)

    # Larger batch: exercises >=2 parallel grid steps (1000 -> 1008, grid=2).
    xl = jax.random.normal(xkey2, (1000, N_IN), dtype=jnp.float32)
    logits_l = neural_network_forward_jit(xl, packed_f32, tm=2048)
    jax.block_until_ready(logits_l)
    assert jnp.allclose(logits_l, reference_forward(xl, params),
                        atol=1e-4, rtol=1e-4)

    # bf16 MXU path (recommended on v5e/v6e/v7x); looser tolerance.
    packed_bf16 = pack_params(params, use_bf16=True)
    logits_bf16 = neural_network_forward_jit(x, packed_bf16, tm=2048)
    jax.block_until_ready(logits_bf16)
    assert jnp.allclose(logits_bf16, ref, atol=3e-2, rtol=3e-2)

    print("KERNEL_OK")
</pallas_src>

<mosaic_0001>
module attributes {stable_mosaic.version = 11 : i64} {
  func.func @mlp_kernel(%arg0: i32, %arg1: memref<8x3xf32, #tpu.memory_space<vmem>>, %arg2: memref<8x256xf32, #tpu.memory_space<vmem>>, %arg3: memref<256x256xf32, #tpu.memory_space<vmem>>, %arg4: memref<256x256xf32, #tpu.memory_space<vmem>>, %arg5: memref<256x128xf32, #tpu.memory_space<vmem>>, %arg6: memref<8x8xf32, #tpu.memory_space<vmem>>) attributes {dimension_semantics = [#tpu.dimension_semantics<parallel>], iteration_bounds = array<i64: 1>, scalar_prefetch = 0 : i64, scratch_operands = 0 : i64, tpu.core_type = #tpu.core_type<tc>, window_params = [{transform_indices = @transform_0, window_bounds = array<i64: 8, 3>}, {pipeline_mode = #tpu.pipeline_mode<synchronous>, transform_indices = @transform_1, window_bounds = array<i64: 8, 256>}, {pipeline_mode = #tpu.pipeline_mode<synchronous>, transform_indices = @transform_2, window_bounds = array<i64: 256, 256>}, {pipeline_mode = #tpu.pipeline_mode<synchronous>, transform_indices = @transform_3, window_bounds = array<i64: 256, 256>}, {pipeline_mode = #tpu.pipeline_mode<synchronous>, transform_indices = @transform_4, window_bounds = array<i64: 256, 128>}, {transform_indices = @transform_5, window_bounds = array<i64: 8, 8>}]} {
    %c0 = arith.constant 0 : index
    %c0_0 = arith.constant 0 : index
    %0 = vector.load %arg1[%c0, %c0_0] : memref<8x3xf32, #tpu.memory_space<vmem>>, vector<8x3xf32>
    %c0_1 = arith.constant 0 : index
    %c0_2 = arith.constant 0 : index
    %1 = vector.load %arg2[%c0_1, %c0_2] : memref<8x256xf32, #tpu.memory_space<vmem>>, vector<8x256xf32>
    %2 = vector.extract_strided_slice %0 {offsets = [0, 0], sizes = [8, 1], strides = [1, 1]} : vector<8x3xf32> to vector<8x1xf32>
    %3 = vector.extract_strided_slice %1 {offsets = [0, 0], sizes = [1, 256], strides = [1, 1]} : vector<8x256xf32> to vector<1x256xf32>
    %4 = vector.broadcast %2 : vector<8x1xf32> to vector<8x256xf32>
    %5 = vector.broadcast %3 : vector<1x256xf32> to vector<8x256xf32>
    %6 = arith.mulf %4, %5 : vector<8x256xf32>
    %7 = vector.extract_strided_slice %0 {offsets = [0, 1], sizes = [8, 1], strides = [1, 1]} : vector<8x3xf32> to vector<8x1xf32>
    %8 = vector.extract_strided_slice %1 {offsets = [1, 0], sizes = [1, 256], strides = [1, 1]} : vector<8x256xf32> to vector<1x256xf32>
    %9 = vector.broadcast %7 : vector<8x1xf32> to vector<8x256xf32>
    %10 = vector.broadcast %8 : vector<1x256xf32> to vector<8x256xf32>
    %11 = arith.mulf %9, %10 : vector<8x256xf32>
    %12 = arith.addf %6, %11 : vector<8x256xf32>
    %13 = vector.extract_strided_slice %0 {offsets = [0, 2], sizes = [8, 1], strides = [1, 1]} : vector<8x3xf32> to vector<8x1xf32>
    %14 = vector.extract_strided_slice %1 {offsets = [2, 0], sizes = [1, 256], strides = [1, 1]} : vector<8x256xf32> to vector<1x256xf32>
    %15 = vector.broadcast %13 : vector<8x1xf32> to vector<8x256xf32>
    %16 = vector.broadcast %14 : vector<1x256xf32> to vector<8x256xf32>
    %17 = arith.mulf %15, %16 : vector<8x256xf32>
    %18 = arith.addf %12, %17 : vector<8x256xf32>
    %19 = vector.extract_strided_slice %1 {offsets = [3, 0], sizes = [1, 256], strides = [1, 1]} : vector<8x256xf32> to vector<1x256xf32>
    %20 = vector.broadcast %19 : vector<1x256xf32> to vector<8x256xf32>
    %21 = arith.addf %18, %20 : vector<8x256xf32>
    %cst = arith.constant 0.000000e+00 : f32
    %22 = vector.broadcast %cst : f32 to vector<8x256xf32>
    %23 = arith.maximumf %21, %22 : vector<8x256xf32>
    %c0_3 = arith.constant 0 : index
    %c0_4 = arith.constant 0 : index
    %24 = vector.load %arg3[%c0_3, %c0_4] : memref<256x256xf32, #tpu.memory_space<vmem>>, vector<256x256xf32>
    %cst_5 = arith.constant dense<0.000000e+00> : vector<8x256xf32>
    %25 = tpu.matmul %23, %24, %cst_5 {dimension_numbers = #tpu.dot_dimension_numbers<[1], [0], [0], [1], [0, 0, 1, 1], [], []>} : vector<8x256xf32>, vector<256x256xf32>, vector<8x256xf32> -> vector<8x256xf32>
    %26 = vector.extract_strided_slice %1 {offsets = [4, 0], sizes = [1, 256], strides = [1, 1]} : vector<8x256xf32> to vector<1x256xf32>
    %27 = vector.broadcast %26 : vector<1x256xf32> to vector<8x256xf32>
    %28 = arith.addf %25, %27 : vector<8x256xf32>
    %cst_6 = arith.constant 0.000000e+00 : f32
    %29 = vector.broadcast %cst_6 : f32 to vector<8x256xf32>
    %30 = arith.maximumf %28, %29 : vector<8x256xf32>
    %c0_7 = arith.constant 0 : index
    %c0_8 = arith.constant 0 : index
    %31 = vector.load %arg4[%c0_7, %c0_8] : memref<256x256xf32, #tpu.memory_space<vmem>>, vector<256x256xf32>
    %cst_9 = arith.constant dense<0.000000e+00> : vector<8x256xf32>
    %32 = tpu.matmul %30, %31, %cst_9 {dimension_numbers = #tpu.dot_dimension_numbers<[1], [0], [0], [1], [0, 0, 1, 1], [], []>} : vector<8x256xf32>, vector<256x256xf32>, vector<8x256xf32> -> vector<8x256xf32>
    %33 = vector.extract_strided_slice %1 {offsets = [5, 0], sizes = [1, 256], strides = [1, 1]} : vector<8x256xf32> to vector<1x256xf32>
    %34 = vector.broadcast %33 : vector<1x256xf32> to vector<8x256xf32>
    %35 = arith.addf %32, %34 : vector<8x256xf32>
    %cst_10 = arith.constant 0.000000e+00 : f32
    %36 = vector.broadcast %cst_10 : f32 to vector<8x256xf32>
    %37 = arith.maximumf %35, %36 : vector<8x256xf32>
    %c0_11 = arith.constant 0 : index
    %c0_12 = arith.constant 0 : index
    %38 = vector.load %arg5[%c0_11, %c0_12] : memref<256x128xf32, #tpu.memory_space<vmem>>, vector<256x128xf32>
    %cst_13 = arith.constant dense<0.000000e+00> : vector<8x128xf32>
    %39 = tpu.matmul %37, %38, %cst_13 {dimension_numbers = #tpu.dot_dimension_numbers<[1], [0], [0], [1], [0, 0, 1, 1], [], []>} : vector<8x256xf32>, vector<256x128xf32>, vector<8x128xf32> -> vector<8x128xf32>
    %40 = vector.extract_strided_slice %39 {offsets = [0, 0], sizes = [8, 8], strides = [1, 1]} : vector<8x128xf32> to vector<8x8xf32>
    %41 = vector.extract_strided_slice %1 {offsets = [6, 0], sizes = [1, 8], strides = [1, 1]} : vector<8x256xf32> to vector<1x8xf32>
    %42 = vector.broadcast %41 : vector<1x8xf32> to vector<8x8xf32>
    %43 = arith.addf %40, %42 : vector<8x8xf32>
    %c0_14 = arith.constant 0 : index
    %c0_15 = arith.constant 0 : index
    %44 = vector.load %arg6[%c0_14, %c0_15] : memref<8x8xf32, #tpu.memory_space<vmem>>, vector<8x8xf32>
    tpu.vector_store %arg6[%c0_14, %c0_15], %43 {strides = array<i32>} : memref<8x8xf32, #tpu.memory_space<vmem>>, vector<8x8xf32>,
    return
  }
  func.func @transform_0(%arg0: i32) -> (i32, i32) {
    %c0_i32 = arith.constant 0 : i32
    %c0_i32_0 = arith.constant 0 : i32
    return %arg0, %c0_i32 : i32, i32
  }
  func.func @transform_1(%arg0: i32) -> (i32, i32) {
    %c0_i32 = arith.constant 0 : i32
    %c0_i32_0 = arith.constant 0 : i32
    %c0_i32_1 = arith.constant 0 : i32
    return %c0_i32, %c0_i32_0 : i32, i32
  }
  func.func @transform_2(%arg0: i32) -> (i32, i32) {
    %c0_i32 = arith.constant 0 : i32
    %c0_i32_0 = arith.constant 0 : i32
    %c0_i32_1 = arith.constant 0 : i32
    return %c0_i32, %c0_i32_0 : i32, i32
  }
  func.func @transform_3(%arg0: i32) -> (i32, i32) {
    %c0_i32 = arith.constant 0 : i32
    %c0_i32_0 = arith.constant 0 : i32
    %c0_i32_1 = arith.constant 0 : i32
    return %c0_i32, %c0_i32_0 : i32, i32
  }
  func.func @transform_4(%arg0: i32) -> (i32, i32) {
    %c0_i32 = arith.constant 0 : i32
    %c0_i32_0 = arith.constant 0 : i32
    %c0_i32_1 = arith.constant 0 : i32
    return %c0_i32, %c0_i32_0 : i32, i32
  }
  func.func @transform_5(%arg0: i32) -> (i32, i32) {
    %c0_i32 = arith.constant 0 : i32
    %c0_i32_0 = arith.constant 0 : i32
    return %arg0, %c0_i32 : i32, i32
  }
}

</mosaic_0001>

<bundles_post_ra>
// kernel: neural_network_forward.1
= control target key start
LH: loop header
LB: loop body
LE: loop exit
PB: predicated region body
PF: predicated region fallthrough
CT: control target
= control target key end

     0   :  { %10 = vsyncpa [#allocation3], 0  ;;  %s972_s0 = inlined_call_operand.vmem [shape: f32[8,3], index: 0, kind: input, shape index: {}]   ;;  %s973_s1 = inlined_call_operand.hbm [shape: f32[8,256], index: 1, kind: input, shape index: {}]   ;;  %s974_s2 = inlined_call_operand.hbm [shape: f32[256,256], index: 2, kind: input, shape index: {}]   ;;  %s975_s3 = inlined_call_operand.hbm [shape: f32[256,256], index: 3, kind: input, shape index: {}]   ;;  %s976_s4 = inlined_call_operand.hbm [shape: f32[256,128], index: 4, kind: input, shape index: {}]   ;;  %s977_s5 = inlined_call_operand.vmem [shape: f32[8,8], index: 5, kind: output, shape index: {}]  }
   0x1   :  { %11 = vsyncpa [#allocation5], 0 }
   0x2   :  { %12 = vsyncpa [#allocation8], 0  ;;  %s845_s18 = smov [#allocation4]   ;;  %s751_s22 = scalar_lea.hbm %s974_s2, 8192 }
   0x3   :  { %s30_s19 = sshll.u32 %s845_s18, 4  ;;  %p752_p0 = scmp.ne.s32.totalorder %s974_s2, %s751_s22  ;;  %s31_s19 = int_to_ptr.vmem [resolvable:$true] %s30_s19 }
   0x4   :  { %p755_p1 = scmp.lt.u32.totalorder %s751_s22, %s974_s2 }
   0x6   :  { %p757_p2 = pnand %p755_p1, %p752_p0 }
   0x8   :  { %760 = shalt.err (!%p757_p2)
}
   0x9   :  { %s761_s27 = scalar_lea.vmem %s31_s19, 8192  ;;  %p766_p4 = scmp.lt.s32.totalorder %s31_s19, %s31_s19 }
   0xa   :  { %p762_p3 = scmp.ne.s32.totalorder %s31_s19, %s761_s27  ;;  %p767_p5 = scmp.lt.s32.totalorder %s761_s27, %s761_s27 }
   0xc   :  { %p768_p6 = por %p767_p5, %p766_p4 }
   0xe   :  { %p769_p7 = pnand %p768_p6, %p762_p3 }
  0x10   :  { %772 = shalt.err (!%p769_p7)
}
  0x11   :  { %s846_s28 = smov 256   ;;  %s847_s29 = smov 16  }
  0x12   :  { %36 = dma.hbm_to_vmem [thread:$0]  %s974_s2, 8192, %s31_s19, [#allocation5], %s846_s28, %s846_s28, %s847_s29  }
  0x13   :  { %s848_s7 = smov [#allocation2]   ;;  %s849_s9 = smov [#allocation6]  }
  0x14   :  { %s21_s8 = sshll.u32 %s848_s7, 4  ;;  %s42_s10 = sshll.u32 %s849_s9, 4  ;;  %s22_s8 = int_to_ptr.vmem [resolvable:$true] %s21_s8  ;;  %s43_s10 = int_to_ptr.vmem [resolvable:$true] %s42_s10 }
  0x15   :  { %s773_s13 = scalar_lea.hbm %s973_s1, 256 }
  0x16   :  { %p774_p8 = scmp.ne.s32.totalorder %s973_s1, %s773_s13  ;;  %p777_p9 = scmp.lt.u32.totalorder %s773_s13, %s973_s1 }
  0x18   :  { %p779_p10 = pnand %p777_p9, %p774_p8 }
  0x1a   :  { %782 = shalt.err (!%p779_p10)
}
  0x1b   :  { %s783_s2 = scalar_lea.vmem %s22_s8, 256  ;;  %p788_p12 = scmp.lt.s32.totalorder %s22_s8, %s22_s8 }
  0x1c   :  { %p784_p11 = scmp.ne.s32.totalorder %s22_s8, %s783_s2  ;;  %p789_p13 = scmp.lt.s32.totalorder %s783_s2, %s783_s2 }
  0x1e   :  { %p790_p0 = por %p789_p13, %p788_p12 }
  0x20   :  { %p791_p1 = pnand %p790_p0, %p784_p11 }
  0x22   :  { %794 = shalt.err (!%p791_p1)
}
  0x23   :  { %24 = dma.hbm_to_vmem [thread:$0]  %s973_s1, 256, %s22_s8, [#allocation3]  }
  0x24   :  { %s795_s22 = scalar_lea.hbm %s975_s3, 8192 }
  0x25   :  { %p796_p2 = scmp.ne.s32.totalorder %s975_s3, %s795_s22  ;;  %p799_p3 = scmp.lt.u32.totalorder %s795_s22, %s975_s3 }
  0x27   :  { %p801_p4 = pnand %p799_p3, %p796_p2 }
  0x29   :  { %804 = shalt.err (!%p801_p4)
}
  0x2a   :  { %s805_s27 = scalar_lea.vmem %s43_s10, 8192  ;;  %p810_p6 = scmp.lt.s32.totalorder %s43_s10, %s43_s10 }
  0x2b   :  { %p806_p5 = scmp.ne.s32.totalorder %s43_s10, %s805_s27  ;;  %p811_p7 = scmp.lt.s32.totalorder %s805_s27, %s805_s27 }
  0x2d   :  { %p812_p8 = por %p811_p7, %p810_p6 }
  0x2f   :  { %p813_p9 = pnand %p812_p8, %p806_p5 }
  0x31   :  { %816 = shalt.err (!%p813_p9)
}
  0x32   :  { %48 = dma.hbm_to_vmem [thread:$0]  %s975_s3, 8192, %s43_s10, [#allocation5], %s846_s28, %s846_s28, %s847_s29  }
  0x33   :  { %s850_s6 = smov [#allocation7]   ;;  %s817_s11 = scalar_lea.hbm %s976_s4, 4096 }
  0x34   :  { %s54_s7 = sshll.u32 %s850_s6, 4  ;;  %p818_p10 = scmp.ne.s32.totalorder %s976_s4, %s817_s11  ;;  %s55_s7 = int_to_ptr.vmem [resolvable:$true] %s54_s7 }
  0x35   :  { %p821_p11 = scmp.lt.u32.totalorder %s817_s11, %s976_s4 }
  0x37   :  { %p823_p12 = pnand %p821_p11, %p818_p10 }
  0x39   :  { %826 = shalt.err (!%p823_p12)
}
  0x3a   :  { %s827_s16 = scalar_lea.vmem %s55_s7, 4096  ;;  %p832_p0 = scmp.lt.s32.totalorder %s55_s7, %s55_s7 }
  0x3b   :  { %p828_p13 = scmp.ne.s32.totalorder %s55_s7, %s827_s16  ;;  %p833_p1 = scmp.lt.s32.totalorder %s827_s16, %s827_s16 }
  0x3d   :  { %p834_p2 = por %p833_p1, %p832_p0 }
  0x3f   :  { %p835_p3 = pnand %p834_p2, %p828_p13 }
  0x41   :  { %838 = shalt.err (!%p835_p3)
}
  0x42   :  { %s851_s3 = smov 128   ;;  %s852_s28 = smov 8  }
  0x43   :  { %60 = dma.hbm_to_vmem [thread:$0]  %s976_s4, 4096, %s55_s7, [#allocation8], %s851_s3, %s851_s3, %s852_s28  }
  0x44   :  { %839 = dma.done.wait [#allocation3], 256  }
  0x45   :  { %840 = vsyncadd [#allocation3], 4294967040 }
  0x46   :  { %841 = dma.done.wait [#allocation5], 16384  }
  0x47   :  { %842 = vsyncadd [#allocation5], 4294950912 }
  0x48   :  { %843 = dma.done.wait [#allocation8], 4096  }
  0x49   :  { %844 = vsyncadd [#allocation8], 4294963200  ;;  %v853_v0 = vmov 0   ;;  %v854_v1 = vmov 2   ;;  %v73_v2 = vld [vmem:[%s972_s0] sm:$0xff]  ;;  %v136_v3 = vld [vmem:[#allocation4 + $0x8] sm:$0xff] }
  0x4a   :  { %747 = vset.pattern.permute.xlu0 %v853_v0  ;;  %749 = vset.pattern.permute.xlu1 %v854_v1  ;;  %v138_v4 = vld [vmem:[#allocation4 + $0x18] sm:$0xff]  ;;  %v135_v6 = vld [vmem:[#allocation4] sm:$0xff]  ;;  %v137_v7 = vld [vmem:[#allocation4 + $0x10] sm:$0xff]  ;;  %v855_v17 = vmov 1   ;;  %vm532_vm0 = vcmask 64512  }
  0x4b   :  { %78 = vperm.xlu0 %747, %v73_v2   ;;  %108 = vperm.xlu1 %749, %v73_v2   ;;  %v576_v5 = vpack.c.bf16 %v138_v4, %v136_v3  ;;  %v140_v8 = vld [vmem:[#allocation4 + $0x28] sm:$0xff]  ;;  %v578_v9 = vpack.c.bf16 %v137_v7, %v135_v6  ;;  %v142_v10 = vld [vmem:[#allocation4 + $0x38] sm:$0xff]  ;;  %v139_v11 = vld [vmem:[#allocation4 + $0x20] sm:$0xff] }
  0x4c   :  { %v141_v12 = vld [vmem:[#allocation4 + $0x30] sm:$0xff]  ;;  %v580_v13 = vpack.c.bf16 %v142_v10, %v140_v8  ;;  %v144_v14 = vld [vmem:[#allocation4 + $0x48] sm:$0xff]  ;;  %v146_v15 = vld [vmem:[#allocation4 + $0x58] sm:$0xff] }
  0x4d   :  { %577 = vmatprep.subr.bf16.mxu0 %v576_v5  ;;  %v582_v16 = vpack.c.bf16 %v141_v12, %v139_v11  ;;  %v584_v18 = vpack.c.bf16 %v146_v15, %v144_v14  ;;  %v143_v19 = vld [vmem:[#allocation4 + $0x40] sm:$0xff]  ;;  %v145_v20 = vld [vmem:[#allocation4 + $0x50] sm:$0xff]  ;;  %v148_v21 = vld [vmem:[#allocation4 + $0x68] sm:$0xff] }
  0x4e   :  { %579 = vmatpush1.bf16.msra.mxu0 %v578_v9  ;;  %v150_v22 = vld [vmem:[#allocation4 + $0x78] sm:$0xff]  ;;  %v586_v23 = vpack.c.bf16 %v145_v20, %v143_v19  ;;  %v147_v25 = vld [vmem:[#allocation4 + $0x60] sm:$0xff]  ;;  %v149_v26 = vld [vmem:[#allocation4 + $0x70] sm:$0xff] }
  0x4f   :  { %748 = vset.pattern.permute.xlu0 %v855_v17  ;;  %581 = vmatprep.subr.bf16.mxu0 %v580_v13  ;;  %v588_v24 = vpack.c.bf16 %v150_v22, %v148_v21  ;;  %v152_v27 = vld [vmem:[#allocation4 + $0x88] sm:$0xff]  ;;  %v154_v28 = vld [vmem:[#allocation4 + $0x98] sm:$0xff]  ;;  %v590_v29 = vpack.c.bf16 %v149_v26, %v147_v25  ;;  %v151_v31 = vld [vmem:[#allocation4 + $0x80] sm:$0xff] }
  0x50   :  { %92 = vperm.xlu0 %748, %v73_v2   ;;  %v592_v30 = vpack.c.bf16 %v154_v28, %v152_v27  ;;  %v153_v32 = vld [vmem:[#allocation4 + $0x90] sm:$0xff]  ;;  %v156_v33 = vld [vmem:[#allocation4 + $0xa8] sm:$0xff]  ;;  %v158_v34 = vld [vmem:[#allocation4 + $0xb8] sm:$0xff] }
  0x51   :  { %v594_v35 = vpack.c.bf16 %v153_v32, %v151_v31  ;;  %v596_v36 = vpack.c.bf16 %v158_v34, %v156_v33  ;;  %v155_v37 = vld [vmem:[#allocation4 + $0xa0] sm:$0xff]  ;;  %v157_v38 = vld [vmem:[#allocation4 + $0xb0] sm:$0xff]  ;;  %v160_v39 = vld [vmem:[#allocation4 + $0xc8] sm:$0xff] }
  0x52   :  { %583 = vmatpush1.bf16.msra.mxu0 %v582_v16  ;;  %v162_v40 = vld [vmem:[#allocation4 + $0xd8] sm:$0xff]  ;;  %v598_v41 = vpack.c.bf16 %v157_v38, %v155_v37  ;;  %v159_v43 = vld [vmem:[#allocation4 + $0xc0] sm:$0xff]  ;;  %v161_v44 = vld [vmem:[#allocation4 + $0xd0] sm:$0xff] }
  0x53   :  { %585 = vmatprep.subr.bf16.mxu0 %v584_v18  ;;  %v600_v42 = vpack.c.bf16 %v162_v40, %v160_v39  ;;  %v164_v45 = vld [vmem:[#allocation4 + $0xe8] sm:$0xff]  ;;  %v166_v46 = vld [vmem:[#allocation4 + $0xf8] sm:$0xff]  ;;  %v163_v49 = vld [vmem:[#allocation4 + $0xe0] sm:$0xff]  ;;  %v602_v54 = vpack.c.bf16 %v161_v44, %v159_v43 }
  0x54   :  { %750 = vset.pattern.permute.xlu0 %v854_v1  ;;  %v281_v47 = vld [vmem:[#allocation6 + $0x8] sm:$0xff]  ;;  %v283_v48 = vld [vmem:[#allocation6 + $0x18] sm:$0xff]  ;;  %v280_v51 = vld [vmem:[#allocation6] sm:$0xff]  ;;  %v604_v59 = vpack.c.bf16 %v166_v46, %v164_v45 }
  0x55   :  { %v640_v50 = vpack.c.bf16 %v283_v48, %v281_v47  ;;  %v282_v52 = vld [vmem:[#allocation6 + $0x10] sm:$0xff]  ;;  %v285_v53 = vld [vmem:[#allocation6 + $0x28] sm:$0xff]  ;;  %v287_v56 = vld [vmem:[#allocation6 + $0x38] sm:$0xff] }
  0x56   :  { %587 = vmatpush1.bf16.msra.mxu0 %v586_v23  ;;  %v642_v55 = vpack.c.bf16 %v282_v52, %v280_v51  ;;  %v284_v57 = vld [vmem:[#allocation6 + $0x20] sm:$0xff]  ;;  %v286_v58 = vld [vmem:[#allocation6 + $0x30] sm:$0xff]  ;;  %v644_v61 = vpack.c.bf16 %v287_v56, %v285_v53  ;;  %v289_v62 = vld [vmem:[#allocation6 + $0x48] sm:$0xff] }
  0x57   :  { %589 = vmatprep.subr.bf16.mxu0 %v588_v24  ;;  %v165_v60 = vld [vmem:[#allocation4 + $0xf0] sm:$0xff]  ;;  %641 = vmatprep.subr.bf16.mxu1 %v640_v50  ;;  %v291_v63 = vld [vmem:[#allocation6 + $0x58] sm:$0xff]  ;;  %v168_v0 = vld [vmem:[#allocation4 + $0x108] sm:$0xff]  ;;  %v646_v2 = vpack.c.bf16 %v286_v58, %v284_v57 }
  0x58   :  { %v170_v1 = vld [vmem:[#allocation4 + $0x118] sm:$0xff]  ;;  %643 = vmatpush1.bf16.msra.mxu1 %v642_v55  ;;  %v648_v3 = vpack.c.bf16 %v291_v63, %v289_v62  ;;  %v288_v4 = vld [vmem:[#allocation6 + $0x40] sm:$0xff]  ;;  %v290_v5 = vld [vmem:[#allocation6 + $0x50] sm:$0xff]  ;;  %v606_v6 = vpack.c.bf16 %v165_v60, %v163_v49 }
  0x59   :  { %645 = vmatprep.subr.bf16.mxu1 %v644_v61  ;;  %v293_v7 = vld [vmem:[#allocation6 + $0x68] sm:$0xff]  ;;  %v295_v8 = vld [vmem:[#allocation6 + $0x78] sm:$0xff]  ;;  %v608_v9 = vpack.c.bf16 %v170_v1, %v168_v0  ;;  %v167_v10 = vld [vmem:[#allocation4 + $0x100] sm:$0xff]  ;;  %v650_v14 = vpack.c.bf16 %v290_v5, %v288_v4 }
  0x5a   :  { %591 = vmatpush1.bf16.msra.mxu0 %v590_v29  ;;  %v169_v11 = vld [vmem:[#allocation4 + $0x110] sm:$0xff]  ;;  %v172_v12 = vld [vmem:[#allocation4 + $0x128] sm:$0xff]  ;;  %v174_v13 = vld [vmem:[#allocation4 + $0x138] sm:$0xff]  ;;  %v652_v15 = vpack.c.bf16 %v295_v8, %v293_v7 }
  0x5b   :  { %593 = vmatprep.subr.bf16.mxu0 %v592_v30  ;;  %v292_v16 = vld [vmem:[#allocation6 + $0x60] sm:$0xff]  ;;  %v294_v17 = vld [vmem:[#allocation6 + $0x70] sm:$0xff]  ;;  %v610_v18 = vpack.c.bf16 %v169_v11, %v167_v10  ;;  %v297_v19 = vld [vmem:[#allocation6 + $0x88] sm:$0xff]  ;;  %v612_v21 = vpack.c.bf16 %v174_v13, %v172_v12 }
  0x5c   :  { %647 = vmatpush1.bf16.msra.mxu1 %v646_v2  ;;  %v299_v20 = vld [vmem:[#allocation6 + $0x98] sm:$0xff]  ;;  %v171_v22 = vld [vmem:[#allocation4 + $0x120] sm:$0xff]  ;;  %v173_v23 = vld [vmem:[#allocation4 + $0x130] sm:$0xff]  ;;  %v654_v26 = vpack.c.bf16 %v294_v17, %v292_v16 }
  0x5d   :  { %649 = vmatprep.subr.bf16.mxu1 %v648_v3  ;;  %v176_v24 = vld [vmem:[#allocation4 + $0x148] sm:$0xff]  ;;  %v178_v25 = vld [vmem:[#allocation4 + $0x158] sm:$0xff]  ;;  %v656_v27 = vpack.c.bf16 %v299_v20, %v297_v19  ;;  %v296_v28 = vld [vmem:[#allocation6 + $0x80] sm:$0xff]  ;;  %v614_v30 = vpack.c.bf16 %v173_v23, %v171_v22 }
  0x5e   :  { %595 = vmatpush1.bf16.msra.mxu0 %v594_v35  ;;  %v298_v29 = vld [vmem:[#allocation6 + $0x90] sm:$0xff]  ;;  %v301_v31 = vld [vmem:[#allocation6 + $0xa8] sm:$0xff]  ;;  %v303_v32 = vld [vmem:[#allocation6 + $0xb8] sm:$0xff]  ;;  %v616_v33 = vpack.c.bf16 %v178_v25, %v176_v24 }
  0x5f   :  { %597 = vmatprep.subr.bf16.mxu0 %v596_v36  ;;  %v175_v34 = vld [vmem:[#allocation4 + $0x140] sm:$0xff]  ;;  %v177_v35 = vld [vmem:[#allocation4 + $0x150] sm:$0xff]  ;;  %v180_v36 = vld [vmem:[#allocation4 + $0x168] sm:$0xff]  ;;  %v658_v38 = vpack.c.bf16 %v298_v29, %v296_v28  ;;  %v660_v39 = vpack.c.bf16 %v303_v32, %v301_v31 }
  0x60   :  { %651 = vmatpush1.bf16.msra.mxu1 %v650_v14  ;;  %v182_v37 = vld [vmem:[#allocation4 + $0x178] sm:$0xff]  ;;  %v300_v40 = vld [vmem:[#allocation6 + $0xa0] sm:$0xff]  ;;  %v305_v43 = vld [vmem:[#allocation6 + $0xc8] sm:$0xff] }
  0x61   :  { %653 = vmatprep.subr.bf16.mxu1 %v652_v15  ;;  %v307_v44 = vld [vmem:[#allocation6 + $0xd8] sm:$0xff]  ;;  %v620_v45 = vpack.c.bf16 %v182_v37, %v180_v36  ;;  %v179_v46 = vld [vmem:[#allocation4 + $0x160] sm:$0xff]  ;;  %v181_v47 = vld [vmem:[#allocation4 + $0x170] sm:$0xff] }
  0x62   :  { %599 = vmatpush1.bf16.msra.mxu0 %v598_v41  ;;  %v302_v41 = vld [vmem:[#allocation6 + $0xb0] sm:$0xff]  ;;  %v184_v48 = vld [vmem:[#allocation4 + $0x188] sm:$0xff]  ;;  %v186_v49 = vld [vmem:[#allocation4 + $0x198] sm:$0xff]  ;;  %v664_v51 = vpack.c.bf16 %v307_v44, %v305_v43 }
  0x63   :  { %601 = vmatprep.subr.bf16.mxu0 %v600_v42  ;;  %v618_v42 = vpack.c.bf16 %v177_v35, %v175_v34  ;;  %v662_v50 = vpack.c.bf16 %v302_v41, %v300_v40  ;;  %v304_v52 = vld [vmem:[#allocation6 + $0xc0] sm:$0xff]  ;;  %v306_v53 = vld [vmem:[#allocation6 + $0xd0] sm:$0xff]  ;;  %v309_v55 = vld [vmem:[#allocation6 + $0xe8] sm:$0xff]  ;;  %v624_v57 = vpack.c.bf16 %v186_v49, %v184_v48 }
  0x64   :  { %655 = vmatpush1.bf16.msra.mxu1 %v654_v26  ;;  %v311_v56 = vld [vmem:[#allocation6 + $0xf8] sm:$0xff]  ;;  %v183_v58 = vld [vmem:[#allocation4 + $0x180] sm:$0xff]  ;;  %v188_v60 = vld [vmem:[#allocation4 + $0x1a8] sm:$0xff]  ;;  %v666_v62 = vpack.c.bf16 %v306_v53, %v304_v52 }
  0x65   :  { %657 = vmatprep.subr.bf16.mxu1 %v656_v27  ;;  %v190_v61 = vld [vmem:[#allocation4 + $0x1b8] sm:$0xff]  ;;  %v668_v63 = vpack.c.bf16 %v311_v56, %v309_v55  ;;  %v308_v0 = vld [vmem:[#allocation6 + $0xe0] sm:$0xff]  ;;  %v310_v1 = vld [vmem:[#allocation6 + $0xf0] sm:$0xff] }
  0x66   :  { %603 = vmatpush1.bf16.msra.mxu0 %v602_v54  ;;  %v622_v54 = vpack.c.bf16 %v181_v47, %v179_v46  ;;  %v313_v3 = vld [vmem:[#allocation6 + $0x108] sm:$0xff]  ;;  %v315_v4 = vld [vmem:[#allocation6 + $0x118] sm:$0xff]  ;;  %v628_v5 = vpack.c.bf16 %v190_v61, %v188_v60  ;;  %v189_v7 = vld [vmem:[#allocation4 + $0x1b0] sm:$0xff]  ;;  %v670_v10 = vpack.c.bf16 %v310_v1, %v308_v0 }
  0x67   :  { %605 = vmatprep.subr.bf16.mxu0 %v604_v59  ;;  %v185_v59 = vld [vmem:[#allocation4 + $0x190] sm:$0xff]  ;;  %v192_v8 = vld [vmem:[#allocation4 + $0x1c8] sm:$0xff]  ;;  %v672_v11 = vpack.c.bf16 %v315_v4, %v313_v3  ;;  %v312_v12 = vld [vmem:[#allocation6 + $0x100] sm:$0xff] }
  0x68   :  { %659 = vmatpush1.bf16.msra.mxu1 %v658_v38  ;;  %v626_v2 = vpack.c.bf16 %v185_v59, %v183_v58  ;;  %v314_v13 = vld [vmem:[#allocation6 + $0x110] sm:$0xff]  ;;  %v317_v15 = vld [vmem:[#allocation6 + $0x128] sm:$0xff]  ;;  %v319_v16 = vld [vmem:[#allocation6 + $0x138] sm:$0xff]  ;;  %v81_v59 = vlaneseq }
  0x69   :  { %661 = vmatprep.subr.bf16.mxu1 %v660_v39  ;;  %v193_v19 = vld [vmem:[#allocation4 + $0x1d0] sm:$0xff]  ;;  %v196_v20 = vld [vmem:[#allocation4 + $0x1e8] sm:$0xff]  ;;  %v674_v22 = vpack.c.bf16 %v314_v13, %v312_v12  ;;  %v676_v23 = vpack.c.bf16 %v319_v16, %v317_v15  ;;  %v316_v24 = vld [vmem:[#allocation6 + $0x120] sm:$0xff] }
  0x6a   :  { %607 = vmatpush1.bf16.msra.mxu0 %v606_v6  ;;  %v187_v6 = vld [vmem:[#allocation4 + $0x1a0] sm:$0xff]  ;;  %v318_v25 = vld [vmem:[#allocation6 + $0x130] sm:$0xff]  ;;  %v321_v27 = vld [vmem:[#allocation6 + $0x148] sm:$0xff]  ;;  %v943_v60 = vshrl.u32 %v81_v59, 7 }
  0x6b   :  { %609 = vmatprep.subr.bf16.mxu0 %v608_v9  ;;  %v194_v9 = vld [vmem:[#allocation4 + $0x1d8] sm:$0xff]  ;;  %v630_v14 = vpack.c.bf16 %v189_v7, %v187_v6  ;;  %v197_v31 = vld [vmem:[#allocation4 + $0x1f0] sm:$0xff]  ;;  %v678_v32 = vpack.c.bf16 %v318_v25, %v316_v24  ;;  %v320_v34 = vld [vmem:[#allocation6 + $0x140] sm:$0xff] }
  0x6c   :  { %663 = vmatpush1.bf16.msra.mxu1 %v662_v50  ;;  %v632_v17 = vpack.c.bf16 %v194_v9, %v192_v8  ;;  %v323_v28 = vld [vmem:[#allocation6 + $0x158] sm:$0xff]  ;;  %v322_v35 = vld [vmem:[#allocation6 + $0x150] sm:$0xff]  ;;  %v325_v37 = vld [vmem:[#allocation6 + $0x168] sm:$0xff]  ;;  %v83_v61 = vsub.s32 0, %v943_v60  ;;  %v97_v0 = vsub.s32 1, %v943_v60  ;;  %v113_v1 = vsub.s32 2, %v943_v60 }
  0x6d   :  { %665 = vmatprep.subr.bf16.mxu1 %v664_v51  ;;  %v327_v38 = vld [vmem:[#allocation6 + $0x178] sm:$0xff]  ;;  %v682_v39 = vpack.c.bf16 %v322_v35, %v320_v34  ;;  %v324_v41 = vld [vmem:[#allocation6 + $0x160] sm:$0xff]  ;;  %v329_v43 = vld [vmem:[#allocation6 + $0x188] sm:$0xff] }
  0x6e   :  { %611 = vmatpush1.bf16.msra.mxu0 %v610_v18  ;;  %v191_v18 = vld [vmem:[#allocation4 + $0x1c0] sm:$0xff]  ;;  %v684_v40 = vpack.c.bf16 %v327_v38, %v325_v37  ;;  %v331_v44 = vld [vmem:[#allocation6 + $0x198] sm:$0xff]  ;;  %v330_v48 = vld [vmem:[#allocation6 + $0x190] sm:$0xff] }
  0x6f   :  { %613 = vmatprep.subr.bf16.mxu0 %v612_v21  ;;  %v198_v21 = vld [vmem:[#allocation4 + $0x1f8] sm:$0xff]  ;;  %v634_v26 = vpack.c.bf16 %v193_v19, %v191_v18  ;;  %v688_v46 = vpack.c.bf16 %v331_v44, %v329_v43  ;;  %v328_v47 = vld [vmem:[#allocation6 + $0x180] sm:$0xff]  ;;  %v333_v49 = vld [vmem:[#allocation6 + $0x1a8] sm:$0xff] }
  0x70   :  { %667 = vmatpush1.bf16.msra.mxu1 %v666_v62  ;;  %v636_v29 = vpack.c.bf16 %v198_v21, %v196_v20  ;;  %v335_v50 = vld [vmem:[#allocation6 + $0x1b8] sm:$0xff]  ;;  %v690_v51 = vpack.c.bf16 %v330_v48, %v328_v47  ;;  %v332_v53 = vld [vmem:[#allocation6 + $0x1a0] sm:$0xff]  ;;  %v337_v55 = vld [vmem:[#allocation6 + $0x1c8] sm:$0xff] }
  0x71   :  { %669 = vmatprep.subr.bf16.mxu1 %v668_v63  ;;  %v692_v52 = vpack.c.bf16 %v335_v50, %v333_v49  ;;  %v339_v56 = vld [vmem:[#allocation6 + $0x1d8] sm:$0xff]  ;;  %v946_v62 = vld [vmem:[#allocation2] sm:$0xff]  ;;  %v340_v34 = vld [vmem:[#allocation6 + $0x1e0] sm:$0xff] }
  0x72   :  { %615 = vmatpush1.bf16.msra.mxu0 %v614_v30  ;;  %v195_v30 = vld [vmem:[#allocation4 + $0x1e0] sm:$0xff]  ;;  %v696_v58 = vpack.c.bf16 %v339_v56, %v337_v55  ;;  %v948_v63 = vld [vmem:[#allocation2 + $0x8] sm:$0xff]  ;;  %v84_v3 = vrot.slane %v946_v62, %v83_v61  ;;  %v114_v7 = vrot.slane %v946_v62, %v113_v1  ;;  %v342_v35 = vld [vmem:[#allocation6 + $0x1f0] sm:$0xff] }
  0x73   :  { %617 = vmatprep.subr.bf16.mxu0 %v616_v33  ;;  %v680_v33 = vpack.c.bf16 %v323_v28, %v321_v27  ;;  %v638_v36 = vpack.c.bf16 %v197_v31, %v195_v30  ;;  %v88_v4 = vrot.slane %v948_v63, %v83_v61  ;;  %v102_v6 = vrot.slane %v948_v63, %v97_v0  ;;  %v336_v28 = vld [vmem:[#allocation6 + $0x1c0] sm:$0xff]  ;;  %v341_v31 = vld [vmem:[#allocation6 + $0x1e8] sm:$0xff]  ;;  %v444_v43 = vld [vmem:[#allocation7 + $0x98] sm:$0xff] }
  0x74   :  { %671 = vmatpush1.bf16.msra.mxu1 %v670_v10  ;;  %v118_v8 = vrot.slane %v948_v63, %v113_v1  ;;  %v125_v10 = vsub.s32 3, %v943_v60  ;;  %v441_v37 = vld [vmem:[#allocation7 + $0x80] sm:$0xff]  ;;  %v442_v38 = vld [vmem:[#allocation7 + $0x88] sm:$0xff]  ;;  %v428_v47 = vld [vmem:[#allocation7 + $0x18] sm:$0xff] }
  0x75   :  { %673 = vmatprep.subr.bf16.mxu1 %v672_v11  ;;  %v445_v48 = vld [vmem:[#allocation7 + $0xa0] sm:$0xff]  ;;  %v446_v49 = vld [vmem:[#allocation7 + $0xa8] sm:$0xff]  ;;  %v448_v55 = vld [vmem:[#allocation7 + $0xb8] sm:$0xff] }
  0x76   :  { %619 = vmatpush1.bf16.msra.mxu0 %v618_v42  ;;  %v326_v42 = vld [vmem:[#allocation6 + $0x170] sm:$0xff]  ;;  %v130_v20 = vrot.slane %v948_v63, %v125_v10  ;;  %v126_v21 = vrot.slane %v946_v62, %v125_v10  ;;  %v432_v59 = vld [vmem:[#allocation7 + $0x38] sm:$0xff]  ;;  %v449_v61 = vld [vmem:[#allocation7 + $0xc0] sm:$0xff] }
  0x77   :  { %621 = vmatprep.subr.bf16.mxu0 %v620_v45  ;;  %v686_v45 = vpack.c.bf16 %v326_v42, %v324_v41  ;;  %v426_v41 = vld [vmem:[#allocation7 + $0x8] sm:$0xff]  ;;  %v443_v42 = vld [vmem:[#allocation7 + $0x90] sm:$0xff]  ;;  %v436_v10 = vld [vmem:[#allocation7 + $0x58] sm:$0xff] }
  0x78   :  { %675 = vmatpush1.bf16.msra.mxu1 %v674_v22 }
  0x79   :  { %677 = vmatprep.subr.bf16.mxu1 %v676_v23 }
  0x7a   :  { %623 = vmatpush1.bf16.msra.mxu0 %v622_v54  ;;  %v334_v54 = vld [vmem:[#allocation6 + $0x1b0] sm:$0xff] }
  0x7b   :  { %625 = vmatprep.subr.bf16.mxu0 %v624_v57  ;;  %v694_v57 = vpack.c.bf16 %v334_v54, %v332_v53  ;;  %v430_v53 = vld [vmem:[#allocation7 + $0x28] sm:$0xff]  ;;  %v447_v54 = vld [vmem:[#allocation7 + $0xb0] sm:$0xff] }
  0x7c   :  { %679 = vmatpush1.bf16.msra.mxu1 %v678_v32  ;;  %v343_v32 = vld [vmem:[#allocation6 + $0x1f8] sm:$0xff] }
  0x7d   :  { %681 = vmatprep.subr.bf16.mxu1 %v680_v33  ;;  %v700_v33 = vpack.c.bf16 %v343_v32, %v341_v31  ;;  %v440_v31 = vld [vmem:[#allocation7 + $0x78] sm:$0xff] }
  0x7e   :  { %627 = vmatpush1.bf16.msra.mxu0 %v626_v2 }
  0x7f   :  { %629 = vmatprep.subr.bf16.mxu0 %v628_v5  ;;  %v98_v5 = vrot.slane %v946_v62, %v97_v0  ;;  %v450_v0 = vld [vmem:[#allocation7 + $0xc8] sm:$0xff] }
  0x80   :  { %683 = vmatpush1.bf16.msra.mxu1 %v682_v39  ;;  %v425_v39 = vld [vmem:[#allocation7] sm:$0xff] }
  0x81   :  { %685 = vmatprep.subr.bf16.mxu1 %v684_v40  ;;  %v704_v40 = vpack.c.bf16 %v442_v38, %v441_v37  ;;  %v706_v44 = vpack.c.bf16 %v426_v41, %v425_v39 }
  0x82   :  { %631 = vmatpush1.bf16.msra.mxu0 %v630_v14 }
  0x83   :  { %633 = vmatprep.subr.bf16.mxu0 %v632_v17 }
  0x84   :  { %687 = vmatpush1.bf16.msra.mxu1 %v686_v45  ;;  %v708_v45 = vpack.c.bf16 %v444_v43, %v443_v42  ;;  %v529_v42 = vsub.s32 6, %v943_v60 }
  0x85   :  { %689 = vmatprep.subr.bf16.mxu1 %v688_v46  ;;  %v427_v46 = vld [vmem:[#allocation7 + $0x10] sm:$0xff] }
  0x86   :  { %635 = vmatpush1.bf16.msra.mxu0 %v634_v26  ;;  %v710_v50 = vpack.c.bf16 %v428_v47, %v427_v46 }
  0x87   :  { %637 = vmatprep.subr.bf16.mxu0 %v636_v29  ;;  %v338_v29 = vld [vmem:[#allocation6 + $0x1d0] sm:$0xff] }
  0x88   :  { %691 = vmatpush1.bf16.msra.mxu1 %v690_v51  ;;  %v698_v30 = vpack.c.bf16 %v338_v29, %v336_v28  ;;  %v712_v51 = vpack.c.bf16 %v446_v49, %v445_v48  ;;  %v456_v28 = vld [vmem:[#allocation7 + $0xf8] sm:$0xff] }
  0x89   :  { %693 = vmatprep.subr.bf16.mxu1 %v692_v52  ;;  %v429_v52 = vld [vmem:[#allocation7 + $0x20] sm:$0xff] }
  0x8a   :  { %639 = vmatpush1.bf16.msra.mxu0 %v638_v36  ;;  %v702_v36 = vpack.c.bf16 %v342_v35, %v340_v34  ;;  %v714_v56 = vpack.c.bf16 %v430_v53, %v429_v52 }
  0x8b   :  { %705 = vmatprep.subr.bf16.mxu0 %v704_v40 }
  0x8c   :  { %695 = vmatpush1.bf16.msra.mxu1 %v694_v57  ;;  %v716_v57 = vpack.c.bf16 %v448_v55, %v447_v54 }
  0x8d   :  { %697 = vmatprep.subr.bf16.mxu1 %v696_v58  ;;  %v431_v58 = vld [vmem:[#allocation7 + $0x30] sm:$0xff] }
  0x8e   :  { %v718_v1 = vpack.c.bf16 %v432_v59, %v431_v58 }
  0x90   :  { %699 = vmatpush1.bf16.msra.mxu1 %v698_v30  ;;  %v439_v30 = vld [vmem:[#allocation7 + $0x70] sm:$0xff] }
  0x91   :  { %701 = vmatprep.subr.bf16.mxu1 %v700_v33  ;;  %v734_v32 = vpack.c.bf16 %v440_v31, %v439_v30  ;;  %v346_v33 = vsub.s32 5, %v943_v60 }
  0x93   :  { %v347_v34 = vrot.slane %v946_v62, %v346_v33  ;;  %v351_v35 = vrot.slane %v948_v63, %v346_v33 }
  0x94   :  { %703 = vmatpush1.bf16.msra.mxu1 %v702_v36 }
  0xca   :  { %v79_v2 = vpop.permute.xlu0 %78  ;;  %v109_v9 = vpop.permute.xlu1 %108 }
  0xcb   :  { %v89_v11 = vmul.f32 %v84_v3, %v79_v2  ;;  %v90_v12 = vmul.f32 %v88_v4, %v79_v2  ;;  %v119_v16 = vmul.f32 %v114_v7, %v109_v9  ;;  %v120_v17 = vmul.f32 %v118_v8, %v109_v9  ;;  %v433_v3 = vld [vmem:[#allocation7 + $0x40] sm:$0xff]  ;;  %v434_v4 = vld [vmem:[#allocation7 + $0x48] sm:$0xff]  ;;  %v435_v9 = vld [vmem:[#allocation7 + $0x50] sm:$0xff] }
  0xcc   :  { %v720_v2 = vpack.c.bf16 %v450_v0, %v449_v61  ;;  %v722_v7 = vpack.c.bf16 %v434_v4, %v433_v3 }
  0xcf   :  { %v93_v13 = vpop.permute.xlu0 %92 }
  0xd0   :  { %v103_v14 = vmul.f32 %v98_v5, %v93_v13  ;;  %v104_v15 = vmul.f32 %v102_v6, %v93_v13  ;;  %v451_v5 = vld [vmem:[#allocation7 + $0xd0] sm:$0xff]  ;;  %v452_v6 = vld [vmem:[#allocation7 + $0xd8] sm:$0xff]  ;;  %v726_v13 = vpack.c.bf16 %v436_v10, %v435_v9 }
  0xd1   :  { %v724_v8 = vpack.c.bf16 %v452_v6, %v451_v5 }
  0xd2   :  { %v105_v18 = vadd.f32 %v103_v14, %v89_v11  ;;  %v106_v19 = vadd.f32 %v104_v15, %v90_v12  ;;  %v453_v11 = vld [vmem:[#allocation7 + $0xe0] sm:$0xff]  ;;  %v454_v12 = vld [vmem:[#allocation7 + $0xe8] sm:$0xff]  ;;  %v201_v15 = vsub.s32 4, %v943_v60 }
  0xd3   :  { %v728_v14 = vpack.c.bf16 %v454_v12, %v453_v11 }
  0xd4   :  { %v121_v22 = vadd.f32 %v119_v16, %v105_v18  ;;  %v122_v23 = vadd.f32 %v120_v17, %v106_v19  ;;  %v202_v16 = vrot.slane %v946_v62, %v201_v15  ;;  %v206_v17 = vrot.slane %v948_v63, %v201_v15 }
  0xd6   :  { %v132_v24 = vadd.f32 %v130_v20, %v122_v23  ;;  %v131_v25 = vadd.f32 %v126_v21, %v121_v22 }
  0xd8   :  { %v134_v26 = vmax.f32 %v132_v24, 0.0  ;;  %v133_v27 = vmax.f32 %v131_v25, 0.0  ;;  %v437_v24 = vld [vmem:[#allocation7 + $0x60] sm:$0xff]  ;;  %v438_v25 = vld [vmem:[#allocation7 + $0x68] sm:$0xff] }
  0xda   :  { %271 = vmatprep.mubr.f32.mxu0 %v134_v26  ;;  %v730_v26 = vpack.c.bf16 %v438_v25, %v437_v24 }
  0xdb   :  { %272 = vmatmul.mubr.f32.vlgmr.msra.gmra.mrb[0].mxu0 %v133_v27  ;;  %v455_v27 = vld [vmem:[#allocation7 + $0xf0] sm:$0xff] }
  0xdc   :  { %707 = vmatpush3.bf16.msra.mxu0 %v706_v44  ;;  %v732_v29 = vpack.c.bf16 %v456_v28, %v455_v27  ;;  %v530_v44 = vrot.slane %v946_v62, %v529_v42 }
  0xdd   :  { %709 = vmatprep.subr.bf16.mxu0 %v708_v45 }
  0xe0   :  { %711 = vmatpush3.bf16.msra.mxu0 %v710_v50 }
  0xe1   :  { %713 = vmatprep.subr.bf16.mxu0 %v712_v51 }
  0xe4   :  { %715 = vmatpush3.bf16.msra.mxu0 %v714_v56 }
  0xe5   :  { %717 = vmatprep.subr.bf16.mxu0 %v716_v57 }
  0xe8   :  { %719 = vmatpush3.bf16.msra.mxu0 %v718_v1 }
  0xe9   :  { %721 = vmatprep.subr.bf16.mxu0 %v720_v2 }
  0xec   :  { %723 = vmatpush3.bf16.msra.mxu0 %v722_v7 }
  0xed   :  { %725 = vmatprep.subr.bf16.mxu0 %v724_v8 }
  0xf0   :  { %727 = vmatpush3.bf16.msra.mxu0 %v726_v13 }
  0xf1   :  { %729 = vmatprep.subr.bf16.mxu0 %v728_v14 }
  0xf4   :  { %731 = vmatpush3.bf16.msra.mxu0 %v730_v26 }
  0xf5   :  { %733 = vmatprep.subr.bf16.mxu0 %v732_v29 }
  0xf8   :  { %735 = vmatpush3.bf16.msra.mxu0 %v734_v32 }
 0x1ae   :  { %v273_v18 = vpop.f32.mrb[0].mxu0 }
 0x1af   :  { %v274_v19 = vadd.f32 %v273_v18, %v202_v16  ;;  %v275_v20 = vpop.f32.mrb[1].mxu0 }
 0x1b0   :  { %v276_v21 = vadd.f32 %v275_v20, %v206_v17 }
 0x1b1   :  { %v278_v23 = vmax.f32 %v274_v19, 0.0 }
 0x1b2   :  { %v279_v22 = vmax.f32 %v276_v21, 0.0 }
 0x1b4   :  { %416 = vmatprep.mubr.f32.mxu1 %v279_v22 }
 0x1b5   :  { %417 = vmatmul.mubr.f32.vlgmr.msra.gmra.mrb[0].mxu1 %v278_v23 }
 0x288   :  { %v418_v36 = vpop.f32.mrb[0].mxu1 }
 0x289   :  { %v419_v37 = vadd.f32 %v418_v36, %v347_v34  ;;  %v420_v38 = vpop.f32.mrb[1].mxu1 }
 0x28a   :  { %v421_v39 = vadd.f32 %v420_v38, %v351_v35 }
 0x28b   :  { %v423_v41 = vmax.f32 %v419_v37, 0.0 }
 0x28c   :  { %v424_v40 = vmax.f32 %v421_v39, 0.0 }
 0x28e   :  { %521 = vmatprep.mubr.f32.mxu0 %v424_v40 }
 0x28f   :  { %522 = vmatmul.mubr.f32.vlgmr.msra.gmra.mrb[2].mxu0 %v423_v41 }
 0x362   :  { %v573_v43 = vpop.f32.mrb[2].mxu0 }
 0x363   :  { %v574_v45 = vpop.f32.mrb[3].mxu0 }
 0x364   :  { %v575_v46 = vadd.f32 %v574_v45, %v573_v43 }
 0x366   :  { %v531_v47 = vadd.f32 %v575_v46, %v530_v44 }
 0x368   :  { %533 = vst.msk [vmem:[%s977_s5] sm:$0xff] %vm532_vm0, %v531_v47 }
 0x369   :  { %538 = vsyncpa [#allocation3], 1 }
 0x36a   :  { %539 = vsyncpa [#allocation5], 1 }
 0x36b   :  { %540 = vsyncpa [#allocation8], 1 }

</bundles_post_ra>
